<compile_context>
chip_gen: v7x
topology: tpu7x:2x2x1
jax: 0.10.0
libtpu: 0.0.40
codegen_flags: <defaults>
</compile_context>

<pallas_src>
import functools

import jax
import jax.numpy as jnp
from jax.experimental import pallas as pl
from jax.experimental.pallas import tpu as pltpu

_BN_EPS = 1e-5
_LANE = 128
_SUBLANE = 16  # bf16 sublane packing; also a multiple of the f32 sublane (8)


def _round_up(x, m):
    return (x + m - 1) // m * m


def _dense_block_kernel(x_ref, w_ref, gamma_ref, beta_ref, o_ref, acc_ref, *, inv_n):
    """One (rows x tn) output tile; K (f_in) streamed over the last grid axis."""
    k = pl.program_id(1)

    @pl.when(k == 0)
    def _init():
        acc_ref[...] = jnp.zeros_like(acc_ref)

    # Linear: y = x @ W^T (bias intentionally dropped -- training-mode BN's mean
    # subtraction cancels it exactly).  bf16 operands, f32 accumulation on the MXU.
    acc_ref[...] += jnp.dot(x_ref[...], w_ref[...],
                            preferred_element_type=jnp.float32)

    @pl.when(k == pl.num_programs(1) - 1)
    def _epilogue():
        # Single-pass batch statistics.  Padded rows of x are all-zero, so they
        # contribute nothing to either sum -- no iota/where mask needed; divide
        # by the true row count via inv_n.
        y = acc_ref[...]
        total = jnp.sum(y, axis=0, keepdims=True)
        total_sq = jnp.sum(y * y, axis=0, keepdims=True)
        mean = total * inv_n
        var = jnp.maximum(total_sq * inv_n - mean * mean, 0.0)  # guard cancellation
        # Fold gamma into the scale and mean into the shift: the only remaining
        # full-tile VPU work is a single multiply-add + ReLU.
        scale = gamma_ref[...] * jax.lax.rsqrt(var + _BN_EPS)
        shift = beta_ref[...] - mean * scale
        o_ref[...] = jnp.maximum(y * scale + shift, 0.0).astype(o_ref.dtype)


def _vmem_capacity_bytes():
    try:
        return int(pltpu.get_tpu_info().vmem_capacity_bytes)
    except Exception:
        return 64 * 1024 * 1024  # conservative: v7x per-TensorCore VMEM


def _select_tiles(n_rows_p, f_in_p, f_out_p, x_elem, out_elem, budget):
    """Pick (tn, tk, est_bytes) so the working set fits `budget` bytes of VMEM."""

    def need(tk, k_tiles, tn):
        x_bufs = 1 if k_tiles == 1 else 2      # constant block index -> 1 buffer
        w_bufs = 3 if k_tiles == 1 else 2      # deeper W pipeline for tiny-M shapes
        return (x_bufs * n_rows_p * tk * x_elem
                + w_bufs * tk * tn * x_elem
                + n_rows_p * tn * 4                 # f32 accumulator scratch
                + 2 * n_rows_p * tn * out_elem      # double-buffered output tile
                + 4 * tn * 4)                       # gamma / beta tiles

    # Feature tile: largest of 512/256/128 that still leaves >= 2 grid steps
    # (second v7x TensorCore gets work; W DMA overlaps compute on all gens).
    tn = 128
    for cand in (512, 256):
        if f_out_p % cand == 0 and f_out_p // cand >= 2:
            tn = cand
            break

    # Prefer keeping x fully resident (single K step); shrink tn first.
    while True:
        est = need(f_in_p, 1, tn)
        if est <= budget:
            return tn, f_in_p, est
        if tn > 128:
            tn //= 2
        else:
            break

    # K-tiled fallback (mainly v7x, 64 MiB VMEM): stream x / W along f_in.
    for tk in (2048, 1024, 512, 256, 128):
        if tk >= f_in_p:
            continue
        k_tiles = pl.cdiv(f_in_p, tk)
        est = need(tk, k_tiles, tn)
        if est <= budget:
            return tn, tk, est
    return tn, 128, need(128, pl.cdiv(f_in_p, 128), tn)


def prepare_dense_block_params(weight, gamma, beta, *, matmul_dtype=jnp.bfloat16):
    """One-time parameter prep (transpose + pad + cast) hoisted out of the
    per-call path so repeated forwards don't re-pay these HBM round trips."""
    f_out, f_in = weight.shape
    f_in_p = _round_up(f_in, _LANE)
    f_out_p = _round_up(f_out, _LANE)
    w_t = jnp.pad(weight.T, ((0, f_in_p - f_in), (0, f_out_p - f_out))).astype(matmul_dtype)
    g_p = jnp.pad(gamma.astype(jnp.float32).reshape(1, f_out),
                  ((0, 0), (0, f_out_p - f_out)), constant_values=1.0)
    b_p = jnp.pad(beta.astype(jnp.float32).reshape(1, f_out),
                  ((0, 0), (0, f_out_p - f_out)))
    return {"w_t": w_t, "gamma": g_p, "beta": b_p,
            "f_in": f_in, "f_out": f_out, "matmul_dtype": matmul_dtype}


def dense_block_forward(x, weight, bias, gamma, beta, *,
                        matmul_dtype=jnp.bfloat16, out_dtype=None, prepared=None):
    """Linear -> BatchNorm1d (training-mode batch statistics) -> ReLU.

    x: (B, F_in) or (B, S, F_in); weight: (F_out, F_in) (PyTorch layout).
    `bias` is accepted for API parity but is mathematically cancelled by the
    training-mode BN mean subtraction, so it is never sent to the kernel.
    Pass out_dtype=jnp.bfloat16 to halve output HBM traffic if the consumer
    tolerates it (default keeps the input dtype, matching the module).
    """
    del bias  # exactly cancelled by the batch-mean subtraction
    # TODO(synk): emit batch mean/var as extra outputs if PyTorch's
    # running_mean / running_var updates need to be maintained.

    orig_shape = x.shape
    x2d = x.reshape(-1, orig_shape[-1]) if x.ndim == 3 else x
    n_rows, f_in = x2d.shape

    if prepared is None:
        prepared = prepare_dense_block_params(weight, gamma, beta,
                                              matmul_dtype=matmul_dtype)
    assert prepared["f_in"] == f_in, (prepared["f_in"], f_in)
    matmul_dtype = prepared["matmul_dtype"]
    w_t, g_p, b_p = prepared["w_t"], prepared["gamma"], prepared["beta"]
    f_out = prepared["f_out"]
    f_in_p, f_out_p = w_t.shape

    out_dtype = jnp.dtype(out_dtype) if out_dtype is not None else jnp.dtype(x2d.dtype)
    x_elem = jnp.dtype(matmul_dtype).itemsize
    out_elem = out_dtype.itemsize

    n_rows_p = _round_up(n_rows, _SUBLANE)

    # Generation-aware tile selection (v7x has half the VMEM of v5e/v6e).
    vmem_cap = _vmem_capacity_bytes()
    tn, tk, est = _select_tiles(n_rows_p, f_in_p, f_out_p, x_elem, out_elem,
                                budget=int(vmem_cap * 0.7))

    # Extra K padding if the K tile doesn't divide the 128-padded f_in
    # (all-zero rows/columns contribute nothing to the matmul or the stats).
    f_in_p2 = _round_up(f_in_p, tk)
    if f_in_p2 != f_in_p:
        w_t = jnp.pad(w_t, ((0, f_in_p2 - f_in_p), (0, 0)))
    k_tiles = f_in_p2 // tk
    n_fout_tiles = f_out_p // tn

    if (n_rows_p, f_in_p2) != x2d.shape:
        x_p = jnp.pad(x2d, ((0, n_rows_p - n_rows), (0, f_in_p2 - f_in)))
    else:
        x_p = x2d
    x_p = x_p.astype(matmul_dtype)

    kernel = functools.partial(_dense_block_kernel, inv_n=1.0 / n_rows)

    x_reads = 1 if k_tiles == 1 else n_fout_tiles
    cost = pl.CostEstimate(
        flops=2 * n_rows_p * f_in_p2 * f_out_p + 8 * n_rows_p * f_out_p,
        transcendentals=f_out_p,  # rsqrt per feature
        bytes_accessed=(x_reads * n_rows_p * f_in_p2 * x_elem
                        + f_in_p2 * f_out_p * x_elem
                        + n_rows_p * f_out_p * out_elem
                        + 2 * f_out_p * 4))

    vmem_limit = int(min(max(est * 1.5 + (4 << 20), 32 << 20), vmem_cap * 0.9))

    def x_map(j, k):
        return (0, k)

    def w_map(j, k):
        return (k, j)

    def vec_map(j, k):
        return (0, j)

    def build_specs(use_pipeline_mode):
        x_kwargs, w_kwargs = {}, {}
        if use_pipeline_mode and k_tiles == 1:
            # x's block index is constant: a second pipeline buffer is pure waste.
            x_kwargs = dict(pipeline_mode=pl.Buffered(1))
            if n_rows_p <= 256 and n_fout_tiles >= 3:
                # Tiny-M shapes are W-streaming bound; deepen the W pipeline.
                w_kwargs = dict(pipeline_mode=pl.Buffered(3))
        in_specs = [
            pl.BlockSpec((n_rows_p, tk), x_map, **x_kwargs),  # x (resident if k_tiles==1)
            pl.BlockSpec((tk, tn), w_map, **w_kwargs),        # W^T tile (streams)
            pl.BlockSpec((1, tn), vec_map),                   # gamma tile
            pl.BlockSpec((1, tn), vec_map),                   # beta tile
        ]
        out_spec = pl.BlockSpec((n_rows_p, tn), vec_map)
        return in_specs, out_spec

    def run(use_pipeline_mode):
        in_specs, out_spec = build_specs(use_pipeline_mode)
        return pl.pallas_call(
            kernel,
            out_shape=jax.ShapeDtypeStruct((n_rows_p, f_out_p), out_dtype),
            grid=(n_fout_tiles, k_tiles),
            in_specs=in_specs,
            out_specs=out_spec,
            scratch_shapes=[pltpu.VMEM((n_rows_p, tn), jnp.float32)],
            compiler_params=pltpu.CompilerParams(
                dimension_semantics=("parallel", "arbitrary"),
                vmem_limit_bytes=vmem_limit),
            cost_estimate=cost,
        )(x_p, w_t, g_p, b_p)

    try:
        out_p = run(True)
    except Exception:  # fallback for jax versions without BlockSpec pipeline_mode
        out_p = run(False)

    out2d = out_p[:n_rows, :f_out]
    if len(orig_shape) == 3:
        return out2d.reshape(orig_shape[0], orig_shape[1], f_out)
    return out2d


def _reference(x, weight, bias, gamma, beta, *, matmul_dtype=jnp.float32):
    """Pure-JAX reference mirroring the PyTorch forward (training-mode BN)."""
    orig_shape = x.shape
    x2d = x.reshape(-1, orig_shape[-1]) if x.ndim == 3 else x
    y = jnp.dot(x2d.astype(matmul_dtype), weight.T.astype(matmul_dtype),
                preferred_element_type=jnp.float32) + bias
    mean = y.mean(axis=0, keepdims=True)
    var = ((y - mean) ** 2).mean(axis=0, keepdims=True)
    y = (y - mean) * jax.lax.rsqrt(var + _BN_EPS) * gamma + beta
    y = jnp.maximum(y, 0.0)
    if x.ndim == 3:
        y = y.reshape(orig_shape[0], orig_shape[1], -1)
    return y


if __name__ == "__main__":
    # Small shapes implied by the module: a 3-D input (batch, seq, in_features).
    B, S, F_IN, F_OUT = 2, 8, 32, 64

    key = jax.random.PRNGKey(0)
    kx, kw, kb = jax.random.split(key, 3)

    x = jax.random.normal(kx, (B, S, F_IN), dtype=jnp.float32)

    # Deterministic parameter init (PyTorch-like uniform scale for Linear;
    # BatchNorm1d defaults: gamma=1, beta=0).
    bound = 1.0 / (F_IN ** 0.5)
    weight = jax.random.uniform(kw, (F_OUT, F_IN), minval=-bound, maxval=bound,
                                dtype=jnp.float32)
    bias = jax.random.uniform(kb, (F_OUT,), minval=-bound, maxval=bound,
                              dtype=jnp.float32)
    gamma = jnp.ones((F_OUT,), dtype=jnp.float32)
    beta = jnp.zeros((F_OUT,), dtype=jnp.float32)

    # Hoist the per-parameter prep (W transpose/pad/cast) out of the call path.
    params = prepare_dense_block_params(weight, gamma, beta)

    out = dense_block_forward(x, weight, bias, gamma, beta, prepared=params)
    out = jax.block_until_ready(out)
    assert out.shape == (B, S, F_OUT), out.shape

    # Tight check vs a reference using the same bf16 matmul operands.
    ref_bf16 = _reference(x, weight, bias, gamma, beta, matmul_dtype=jnp.bfloat16)
    assert jnp.allclose(out, ref_bf16, atol=5e-3, rtol=5e-3), \
        "mismatch vs bf16-matmul reference"

    # Loose sanity check vs the exact f32 PyTorch-style forward (bf16 matmul
    # introduces ~0.2% operand rounding).
    ref_f32 = _reference(x, weight, bias, gamma, beta, matmul_dtype=jnp.float32)
    assert jnp.allclose(out, ref_f32, atol=5e-2, rtol=5e-2), \
        "mismatch vs f32 reference"

    print("KERNEL_OK")
</pallas_src>

<mosaic_0001>
module attributes {stable_mosaic.version = 11 : i64} {
  func.func @_dense_block_kernel(%arg0: i32, %arg1: i32, %arg2: memref<16x128xbf16, #tpu.memory_space<vmem>>, %arg3: memref<128x128xbf16, #tpu.memory_space<vmem>>, %arg4: memref<1x128xf32, #tpu.memory_space<vmem>>, %arg5: memref<1x128xf32, #tpu.memory_space<vmem>>, %arg6: memref<16x128xf32, #tpu.memory_space<vmem>>, %arg7: memref<16x128xf32, #tpu.memory_space<vmem>>) attributes {dimension_semantics = [#tpu.dimension_semantics<parallel>, #tpu.dimension_semantics<arbitrary>], iteration_bounds = array<i64: 1, 1>, scalar_prefetch = 0 : i64, scratch_operands = 1 : i64, tpu.core_type = #tpu.core_type<tc>, window_params = [{pipeline_mode = #tpu.pipeline_mode<synchronous>, transform_indices = @transform_0, window_bounds = array<i64: 16, 128>}, {transform_indices = @transform_1, window_bounds = array<i64: 128, 128>}, {transform_indices = @transform_2, window_bounds = array<i64: 1, 128>}, {transform_indices = @transform_3, window_bounds = array<i64: 1, 128>}, {transform_indices = @transform_4, window_bounds = array<i64: 16, 128>}]} {
    %c0_i32 = arith.constant 0 : i32
    %0 = arith.cmpi eq, %arg1, %c0_i32 : i32
    %1 = arith.extui %0 : i1 to i32
    %c0_i32_0 = arith.constant 0 : i32
    %2 = arith.cmpi ne, %1, %c0_i32_0 : i32
    scf.if %2 {
      %cst_10 = arith.constant 0.000000e+00 : f32
      %12 = vector.broadcast %cst_10 : f32 to vector<16x128xf32>
      %c0_11 = arith.constant 0 : index
      %c0_12 = arith.constant 0 : index
      %13 = vector.load %arg7[%c0_11, %c0_12] : memref<16x128xf32, #tpu.memory_space<vmem>>, vector<16x128xf32>
      tpu.vector_store %arg7[%c0_11, %c0_12], %12 {strides = array<i32>} : memref<16x128xf32, #tpu.memory_space<vmem>>, vector<16x128xf32>,
    } else {
    }
    %c0 = arith.constant 0 : index
    %c0_1 = arith.constant 0 : index
    %3 = vector.load %arg7[%c0, %c0_1] : memref<16x128xf32, #tpu.memory_space<vmem>>, vector<16x128xf32>
    %c0_2 = arith.constant 0 : index
    %c0_3 = arith.constant 0 : index
    %4 = vector.load %arg2[%c0_2, %c0_3] : memref<16x128xbf16, #tpu.memory_space<vmem>>, vector<16x128xbf16>
    %c0_4 = arith.constant 0 : index
    %c0_5 = arith.constant 0 : index
    %5 = vector.load %arg3[%c0_4, %c0_5] : memref<128x128xbf16, #tpu.memory_space<vmem>>, vector<128x128xbf16>
    %cst = arith.constant dense<0.000000e+00> : vector<16x128xf32>
    %6 = tpu.matmul %4, %5, %cst {dimension_numbers = #tpu.dot_dimension_numbers<[1], [0], [0], [1], [0, 0, 1, 1], [], []>} : vector<16x128xbf16>, vector<128x128xbf16>, vector<16x128xf32> -> vector<16x128xf32>
    %7 = arith.addf %3, %6 : vector<16x128xf32>
    %c0_6 = arith.constant 0 : index
    %c0_7 = arith.constant 0 : index
    %8 = vector.load %arg7[%c0_6, %c0_7] : memref<16x128xf32, #tpu.memory_space<vmem>>, vector<16x128xf32>
    tpu.vector_store %arg7[%c0_6, %c0_7], %7 {strides = array<i32>} : memref<16x128xf32, #tpu.memory_space<vmem>>, vector<16x128xf32>,
    %c0_i32_8 = arith.constant 0 : i32
    %9 = arith.cmpi eq, %arg1, %c0_i32_8 : i32
    %10 = arith.extui %9 : i1 to i32
    %c0_i32_9 = arith.constant 0 : i32
    %11 = arith.cmpi ne, %10, %c0_i32_9 : i32
    scf.if %11 {
      %c0_10 = arith.constant 0 : index
      %c0_11 = arith.constant 0 : index
      %12 = vector.load %arg7[%c0_10, %c0_11] : memref<16x128xf32, #tpu.memory_space<vmem>>, vector<16x128xf32>
      %cst_12 = arith.constant dense<0.000000e+00> : vector<128xf32>
      %13 = vector.multi_reduction <add>, %12, %cst_12 [0] : vector<16x128xf32> to vector<128xf32>
      %14 = vector.shape_cast %13 : vector<128xf32> to vector<1x128xf32>
      %15 = arith.mulf %12, %12 : vector<16x128xf32>
      %cst_13 = arith.constant dense<0.000000e+00> : vector<128xf32>
      %16 = vector.multi_reduction <add>, %15, %cst_13 [0] : vector<16x128xf32> to vector<128xf32>
      %17 = vector.shape_cast %16 : vector<128xf32> to vector<1x128xf32>
      %cst_14 = arith.constant 6.250000e-02 : f32
      %18 = vector.broadcast %cst_14 : f32 to vector<1x128xf32>
      %19 = arith.mulf %14, %18 : vector<1x128xf32>
      %cst_15 = arith.constant 6.250000e-02 : f32
      %20 = vector.broadcast %cst_15 : f32 to vector<1x128xf32>
      %21 = arith.mulf %17, %20 : vector<1x128xf32>
      %22 = arith.mulf %19, %19 : vector<1x128xf32>
      %23 = arith.subf %21, %22 : vector<1x128xf32>
      %cst_16 = arith.constant 0.000000e+00 : f32
      %24 = vector.broadcast %cst_16 : f32 to vector<1x128xf32>
      %25 = arith.maximumf %23, %24 : vector<1x128xf32>
      %c0_17 = arith.constant 0 : index
      %c0_18 = arith.constant 0 : index
      %26 = vector.load %arg4[%c0_17, %c0_18] : memref<1x128xf32, #tpu.memory_space<vmem>>, vector<1x128xf32>
      %cst_19 = arith.constant 9.99999974E-6 : f32
      %27 = vector.broadcast %cst_19 : f32 to vector<1x128xf32>
      %28 = arith.addf %25, %27 : vector<1x128xf32>
      %29 = math.rsqrt %28 : vector<1x128xf32>
      %30 = arith.mulf %26, %29 : vector<1x128xf32>
      %c0_20 = arith.constant 0 : index
      %c0_21 = arith.constant 0 : index
      %31 = vector.load %arg5[%c0_20, %c0_21] : memref<1x128xf32, #tpu.memory_space<vmem>>, vector<1x128xf32>
      %32 = arith.mulf %19, %30 : vector<1x128xf32>
      %33 = arith.subf %31, %32 : vector<1x128xf32>
      %34 = vector.broadcast %30 : vector<1x128xf32> to vector<16x128xf32>
      %35 = arith.mulf %12, %34 : vector<16x128xf32>
      %36 = vector.broadcast %33 : vector<1x128xf32> to vector<16x128xf32>
      %37 = arith.addf %35, %36 : vector<16x128xf32>
      %cst_22 = arith.constant 0.000000e+00 : f32
      %38 = vector.broadcast %cst_22 : f32 to vector<16x128xf32>
      %39 = arith.maximumf %37, %38 : vector<16x128xf32>
      %c0_23 = arith.constant 0 : index
      %c0_24 = arith.constant 0 : index
      %40 = vector.load %arg6[%c0_23, %c0_24] : memref<16x128xf32, #tpu.memory_space<vmem>>, vector<16x128xf32>
      tpu.vector_store %arg6[%c0_23, %c0_24], %39 {strides = array<i32>} : memref<16x128xf32, #tpu.memory_space<vmem>>, vector<16x128xf32>,
    } else {
    }
    return
  }
  func.func @transform_0(%arg0: i32, %arg1: i32) -> (i32, i32) {
    %c0_i32 = arith.constant 0 : i32
    %c0_i32_0 = arith.constant 0 : i32
    return %c0_i32, %arg1 : i32, i32
  }
  func.func @transform_1(%arg0: i32, %arg1: i32) -> (i32, i32) {
    %c0_i32 = arith.constant 0 : i32
    return %arg1, %arg0 : i32, i32
  }
  func.func @transform_2(%arg0: i32, %arg1: i32) -> (i32, i32) {
    %c0_i32 = arith.constant 0 : i32
    %c0_i32_0 = arith.constant 0 : i32
    return %c0_i32, %arg0 : i32, i32
  }
  func.func @transform_3(%arg0: i32, %arg1: i32) -> (i32, i32) {
    %c0_i32 = arith.constant 0 : i32
    %c0_i32_0 = arith.constant 0 : i32
    return %c0_i32, %arg0 : i32, i32
  }
  func.func @transform_4(%arg0: i32, %arg1: i32) -> (i32, i32) {
    %c0_i32 = arith.constant 0 : i32
    %c0_i32_0 = arith.constant 0 : i32
    return %c0_i32, %arg0 : i32, i32
  }
}

module attributes {stable_mosaic.version = 11 : i64} {
  func.func @_dense_block_kernel(%arg0: i32, %arg1: i32, %arg2: memref<16x128xbf16, #tpu.memory_space<vmem>>, %arg3: memref<128x128xbf16, #tpu.memory_space<vmem>>, %arg4: memref<1x128xf32, #tpu.memory_space<vmem>>, %arg5: memref<1x128xf32, #tpu.memory_space<vmem>>, %arg6: memref<16x128xf32, #tpu.memory_space<vmem>>, %arg7: memref<16x128xf32, #tpu.memory_space<vmem>>) attributes {dimension_semantics = [#tpu.dimension_semantics<parallel>, #tpu.dimension_semantics<arbitrary>], iteration_bounds = array<i64: 1, 1>, scalar_prefetch = 0 : i64, scratch_operands = 1 : i64, tpu.core_type = #tpu.core_type<tc>, window_params = [{transform_indices = @transform_0, window_bounds = array<i64: 16, 128>}, {transform_indices = @transform_1, window_bounds = array<i64: 128, 128>}, {transform_indices = @transform_2, window_bounds = array<i64: 1, 128>}, {transform_indices = @transform_3, window_bounds = array<i64: 1, 128>}, {transform_indices = @transform_4, window_bounds = array<i64: 16, 128>}]} {
    %c0_i32 = arith.constant 0 : i32
    %0 = arith.cmpi eq, %arg1, %c0_i32 : i32
    %1 = arith.extui %0 : i1 to i32
    %c0_i32_0 = arith.constant 0 : i32
    %2 = arith.cmpi ne, %1, %c0_i32_0 : i32
    scf.if %2 {
      %cst_10 = arith.constant 0.000000e+00 : f32
      %12 = vector.broadcast %cst_10 : f32 to vector<16x128xf32>
      %c0_11 = arith.constant 0 : index
      %c0_12 = arith.constant 0 : index
      %13 = vector.load %arg7[%c0_11, %c0_12] : memref<16x128xf32, #tpu.memory_space<vmem>>, vector<16x128xf32>
      tpu.vector_store %arg7[%c0_11, %c0_12], %12 {strides = array<i32>} : memref<16x128xf32, #tpu.memory_space<vmem>>, vector<16x128xf32>,
    } else {
    }
    %c0 = arith.constant 0 : index
    %c0_1 = arith.constant 0 : index
    %3 = vector.load %arg7[%c0, %c0_1] : memref<16x128xf32, #tpu.memory_space<vmem>>, vector<16x128xf32>
    %c0_2 = arith.constant 0 : index
    %c0_3 = arith.constant 0 : index
    %4 = vector.load %arg2[%c0_2, %c0_3] : memref<16x128xbf16, #tpu.memory_space<vmem>>, vector<16x128xbf16>
    %c0_4 = arith.constant 0 : index
    %c0_5 = arith.constant 0 : index
    %5 = vector.load %arg3[%c0_4, %c0_5] : memref<128x128xbf16, #tpu.memory_space<vmem>>, vector<128x128xbf16>
    %cst = arith.constant dense<0.000000e+00> : vector<16x128xf32>
    %6 = tpu.matmul %4, %5, %cst {dimension_numbers = #tpu.dot_dimension_numbers<[1], [0], [0], [1], [0, 0, 1, 1], [], []>} : vector<16x128xbf16>, vector<128x128xbf16>, vector<16x128xf32> -> vector<16x128xf32>
    %7 = arith.addf %3, %6 : vector<16x128xf32>
    %c0_6 = arith.constant 0 : index
    %c0_7 = arith.constant 0 : index
    %8 = vector.load %arg7[%c0_6, %c0_7] : memref<16x128xf32, #tpu.memory_space<vmem>>, vector<16x128xf32>
    tpu.vector_store %arg7[%c0_6, %c0_7], %7 {strides = array<i32>} : memref<16x128xf32, #tpu.memory_space<vmem>>, vector<16x128xf32>,
    %c0_i32_8 = arith.constant 0 : i32
    %9 = arith.cmpi eq, %arg1, %c0_i32_8 : i32
    %10 = arith.extui %9 : i1 to i32
    %c0_i32_9 = arith.constant 0 : i32
    %11 = arith.cmpi ne, %10, %c0_i32_9 : i32
    scf.if %11 {
      %c0_10 = arith.constant 0 : index
      %c0_11 = arith.constant 0 : index
      %12 = vector.load %arg7[%c0_10, %c0_11] : memref<16x128xf32, #tpu.memory_space<vmem>>, vector<16x128xf32>
      %cst_12 = arith.constant dense<0.000000e+00> : vector<128xf32>
      %13 = vector.multi_reduction <add>, %12, %cst_12 [0] : vector<16x128xf32> to vector<128xf32>
      %14 = vector.shape_cast %13 : vector<128xf32> to vector<1x128xf32>
      %15 = arith.mulf %12, %12 : vector<16x128xf32>
      %cst_13 = arith.constant dense<0.000000e+00> : vector<128xf32>
      %16 = vector.multi_reduction <add>, %15, %cst_13 [0] : vector<16x128xf32> to vector<128xf32>
      %17 = vector.shape_cast %16 : vector<128xf32> to vector<1x128xf32>
      %cst_14 = arith.constant 6.250000e-02 : f32
      %18 = vector.broadcast %cst_14 : f32 to vector<1x128xf32>
      %19 = arith.mulf %14, %18 : vector<1x128xf32>
      %cst_15 = arith.constant 6.250000e-02 : f32
      %20 = vector.broadcast %cst_15 : f32 to vector<1x128xf32>
      %21 = arith.mulf %17, %20 : vector<1x128xf32>
      %22 = arith.mulf %19, %19 : vector<1x128xf32>
      %23 = arith.subf %21, %22 : vector<1x128xf32>
      %cst_16 = arith.constant 0.000000e+00 : f32
      %24 = vector.broadcast %cst_16 : f32 to vector<1x128xf32>
      %25 = arith.maximumf %23, %24 : vector<1x128xf32>
      %c0_17 = arith.constant 0 : index
      %c0_18 = arith.constant 0 : index
      %26 = vector.load %arg4[%c0_17, %c0_18] : memref<1x128xf32, #tpu.memory_space<vmem>>, vector<1x128xf32>
      %cst_19 = arith.constant 9.99999974E-6 : f32
      %27 = vector.broadcast %cst_19 : f32 to vector<1x128xf32>
      %28 = arith.addf %25, %27 : vector<1x128xf32>
      %29 = math.rsqrt %28 : vector<1x128xf32>
      %30 = arith.mulf %26, %29 : vector<1x128xf32>
      %c0_20 = arith.constant 0 : index
      %c0_21 = arith.constant 0 : index
      %31 = vector.load %arg5[%c0_20, %c0_21] : memref<1x128xf32, #tpu.memory_space<vmem>>, vector<1x128xf32>
      %32 = arith.mulf %19, %30 : vector<1x128xf32>
      %33 = arith.subf %31, %32 : vector<1x128xf32>
      %34 = vector.broadcast %30 : vector<1x128xf32> to vector<16x128xf32>
      %35 = arith.mulf %12, %34 : vector<16x128xf32>
      %36 = vector.broadcast %33 : vector<1x128xf32> to vector<16x128xf32>
      %37 = arith.addf %35, %36 : vector<16x128xf32>
      %cst_22 = arith.constant 0.000000e+00 : f32
      %38 = vector.broadcast %cst_22 : f32 to vector<16x128xf32>
      %39 = arith.maximumf %37, %38 : vector<16x128xf32>
      %c0_23 = arith.constant 0 : index
      %c0_24 = arith.constant 0 : index
      %40 = vector.load %arg6[%c0_23, %c0_24] : memref<16x128xf32, #tpu.memory_space<vmem>>, vector<16x128xf32>
      tpu.vector_store %arg6[%c0_23, %c0_24], %39 {strides = array<i32>} : memref<16x128xf32, #tpu.memory_space<vmem>>, vector<16x128xf32>,
    } else {
    }
    return
  }
  func.func @transform_0(%arg0: i32, %arg1: i32) -> (i32, i32) {
    %c0_i32 = arith.constant 0 : i32
    %c0_i32_0 = arith.constant 0 : i32
    return %c0_i32, %arg1 : i32, i32
  }
  func.func @transform_1(%arg0: i32, %arg1: i32) -> (i32, i32) {
    %c0_i32 = arith.constant 0 : i32
    return %arg1, %arg0 : i32, i32
  }
  func.func @transform_2(%arg0: i32, %arg1: i32) -> (i32, i32) {
    %c0_i32 = arith.constant 0 : i32
    %c0_i32_0 = arith.constant 0 : i32
    return %c0_i32, %arg0 : i32, i32
  }
  func.func @transform_3(%arg0: i32, %arg1: i32) -> (i32, i32) {
    %c0_i32 = arith.constant 0 : i32
    %c0_i32_0 = arith.constant 0 : i32
    return %c0_i32, %arg0 : i32, i32
  }
  func.func @transform_4(%arg0: i32, %arg1: i32) -> (i32, i32) {
    %c0_i32 = arith.constant 0 : i32
    %c0_i32_0 = arith.constant 0 : i32
    return %c0_i32, %arg0 : i32, i32
  }
}

</mosaic_0001>

<bundles_post_ra>
// kernel: tpu_custom_call.1
= control target key start
LH: loop header
LB: loop body
LE: loop exit
PB: predicated region body
PF: predicated region fallthrough
CT: control target
= control target key end

     0   :  { %9 = vsyncpa [#allocation4], 0  ;;  %s449_s0 = inlined_call_operand.hbm [shape: bf16[16,128], index: 0, kind: input, shape index: {}]   ;;  %s450_s1 = inlined_call_operand.hbm [shape: bf16[128,128], index: 1, kind: input, shape index: {}]   ;;  %s451_s2 = inlined_call_operand.vmem [shape: f32[1,128], index: 2, kind: input, shape index: {}]   ;;  %s452_s3 = inlined_call_operand.vmem [shape: f32[1,128], index: 3, kind: input, shape index: {}]   ;;  %s453_s4 = inlined_call_operand.hbm [shape: f32[16,128], index: 4, kind: output, shape index: {}]  }
   0x1   :  { %10 = vsyncpa [#allocation7], 0 }
   0x2   :  { %11 = vsyncpa [#allocation5], 0  ;;  %s373_s15 = smov [#allocation3]   ;;  %s301_s19 = scalar_lea.hbm %s449_s0, 128 }
   0x3   :  { %s17_s16 = sshll.u32 %s373_s15, 4  ;;  %p302_p0 = scmp.ne.s32.totalorder %s449_s0, %s301_s19  ;;  %s18_s16 = int_to_ptr.vmem [resolvable:$true] %s17_s16 }
   0x4   :  { %p305_p1 = scmp.lt.u32.totalorder %s301_s19, %s449_s0 }
   0x6   :  { %p307_p2 = pnand %p305_p1, %p302_p0 }
   0x8   :  { %310 = shalt.err (!%p307_p2)
}
   0x9   :  { %s311_s24 = scalar_lea.vmem %s18_s16, 128  ;;  %p316_p4 = scmp.lt.s32.totalorder %s18_s16, %s18_s16 }
   0xa   :  { %p312_p3 = scmp.ne.s32.totalorder %s18_s16, %s311_s24  ;;  %p317_p5 = scmp.lt.s32.totalorder %s311_s24, %s311_s24 }
   0xc   :  { %p318_p6 = por %p317_p5, %p316_p4 }
   0xe   :  { %p319_p7 = pnand %p318_p6, %p312_p3 }
  0x10   :  { %322 = shalt.err (!%p319_p7)
}
  0x11   :  { %s374_s25 = smov 64   ;;  %s375_s26 = smov 4  }
  0x12   :  { %23 = dma.hbm_to_vmem [thread:$0]  %s449_s0, 128, %s18_s16, [#allocation4], %s374_s25, %s374_s25, %s375_s26  }
  0x13   :  { %s376_s29 = smov [#allocation6]   ;;  %s323_s7 = scalar_lea.hbm %s450_s1, 1024 }
  0x14   :  { %s29_s30 = sshll.u32 %s376_s29, 4  ;;  %p324_p8 = scmp.ne.s32.totalorder %s450_s1, %s323_s7  ;;  %s30_s30 = int_to_ptr.vmem [resolvable:$true] %s29_s30 }
  0x15   :  { %p327_p9 = scmp.lt.u32.totalorder %s323_s7, %s450_s1 }
  0x17   :  { %p329_p10 = pnand %p327_p9, %p324_p8 }
  0x19   :  { %332 = shalt.err (!%p329_p10)
}
  0x1a   :  { %s333_s12 = scalar_lea.vmem %s30_s30, 1024  ;;  %p338_p12 = scmp.lt.s32.totalorder %s30_s30, %s30_s30 }
  0x1b   :  { %p334_p11 = scmp.ne.s32.totalorder %s30_s30, %s333_s12  ;;  %p339_p13 = scmp.lt.s32.totalorder %s333_s12, %s333_s12 }
  0x1d   :  { %p340_p0 = por %p339_p13, %p338_p12 }
  0x1f   :  { %p341_p1 = pnand %p340_p0, %p334_p11 }
  0x21   :  { %344 = shalt.err (!%p341_p1)
}
  0x22   :  { %35 = dma.hbm_to_vmem [thread:$0]  %s450_s1, 1024, %s30_s30, [#allocation7], %s374_s25, %s374_s25, %s375_s26  }
  0x23   :  { %367 = dma.done.wait [#allocation4], 128  }
  0x24   :  { %368 = vsyncadd [#allocation4], 4294967168 }
  0x25   :  { %369 = dma.done.wait [#allocation7], 1024  }
  0x26   :  { %370 = vsyncadd [#allocation7], 4294966272  ;;  %v377_v0 = vmov 0.0   ;;  %vm378_vm0 = vmmov 0   ;;  %v290_v1 = vld [vmem:[#allocation6] sm:$0xff]   ;;  %v291_v2 = vld [vmem:[#allocation6 + $0x8] sm:$0xff]   ;;  %v206_v36 = vlaneseq }
  0x27   :  { %261 = vmatprep.subr.bf16.mxu0 %v377_v0  ;;  %277 = vmatprep.mubr.msk.bf16.mxu0 %vm378_vm0, %v377_v0  ;;  %v292_v3 = vld [vmem:[#allocation6 + $0x10] sm:$0xff]   ;;  %v293_v4 = vld [vmem:[#allocation6 + $0x18] sm:$0xff]   ;;  %v294_v5 = vld [vmem:[#allocation6 + $0x20] sm:$0xff]   ;;  %s379_s17 = smov [#allocation8]  }
  0x28   :  { %262 = vmatpush3.bf16.msra.mxu0 %v290_v1  ;;  %v295_v6 = vld [vmem:[#allocation6 + $0x28] sm:$0xff]   ;;  %v296_v7 = vld [vmem:[#allocation6 + $0x30] sm:$0xff]   ;;  %v297_v8 = vld [vmem:[#allocation6 + $0x38] sm:$0xff]   ;;  %v207_v37 = vshrl.u32 %v206_v36, 7  ;;  %s230_s18 = sshll.u32 %s379_s17, 4  ;;  %s231_s18 = int_to_ptr.vmem [resolvable:$true] %s230_s18 }
  0x29   :  { %263 = vmatprep.subr.bf16.mxu0 %v377_v0  ;;  %v298_v9 = vld [vmem:[#allocation3] sm:$0xff]   ;;  %p350_p3 = scmp.lt.s32.totalorder %s231_s18, %s231_s18 }
  0x2a   :  { %v198_v38 = vld [vmem:[%s451_s2] sm:$0x1]  ;;  %v208_v39 = vsub.s32 0, %v207_v37  ;;  %s345_s2 = scalar_lea.vmem %s231_s18, 256 }
  0x2b   :  { %v202_v42 = vld [vmem:[%s452_s3] sm:$0x1]  ;;  %p346_p2 = scmp.ne.s32.totalorder %s231_s18, %s345_s2  ;;  %p351_p4 = scmp.lt.s32.totalorder %s345_s2, %s345_s2 }
  0x2c   :  { %264 = vmatpush3.bf16.msra.mxu0 %v291_v2 }
  0x2d   :  { %265 = vmatprep.subr.bf16.mxu0 %v377_v0  ;;  %p352_p5 = por %p351_p4, %p350_p3 }
  0x2f   :  { %p353_p6 = pnand %p352_p5, %p346_p2 }
  0x30   :  { %266 = vmatpush3.bf16.msra.mxu0 %v292_v3 }
  0x31   :  { %267 = vmatprep.subr.bf16.mxu0 %v377_v0 }
  0x34   :  { %268 = vmatpush3.bf16.msra.mxu0 %v293_v4 }
  0x35   :  { %269 = vmatprep.subr.bf16.mxu0 %v377_v0 }
  0x38   :  { %270 = vmatpush3.bf16.msra.mxu0 %v294_v5 }
  0x39   :  { %271 = vmatprep.subr.bf16.mxu0 %v377_v0 }
  0x3c   :  { %272 = vmatpush3.bf16.msra.mxu0 %v295_v6 }
  0x3d   :  { %273 = vmatprep.subr.bf16.mxu0 %v377_v0 }
  0x40   :  { %274 = vmatpush3.bf16.msra.mxu0 %v296_v7 }
  0x41   :  { %275 = vmatprep.subr.bf16.mxu0 %v377_v0 }
  0x44   :  { %276 = vmatpush3.bf16.msra.mxu0 %v297_v8 }
  0x47   :  { %278 = vmatmul.mubr.bf16.vlgmr.msra.gmra.mrb[0].mxu0 %v298_v9 }
 0x11a   :  { %v161_v10 = vpop.f32.mrb[0].mxu0 }
 0x11b   :  { %v279_v11 = vpop.f32.mrb[1].mxu0  ;;  %v184_v13 = vmul.f32 %v161_v10, %v161_v10 }
 0x11c   :  { %v164_v12 = vpop.f32.mrb[2].mxu0 }
 0x11d   :  { %v177_v14 = vadd.f32 %v164_v12, %v161_v10  ;;  %v185_v15 = vmul.f32 %v164_v12, %v164_v12  ;;  %v280_v16 = vpop.f32.mrb[3].mxu0 }
 0x11f   :  { %v178_v17 = vrot.slane %v177_v14, 4  ;;  %v186_v18 = vadd.f32 %v185_v15, %v184_v13 }
 0x121   :  { %v179_v19 = vadd.f32 %v178_v17, %v177_v14  ;;  %v187_v20 = vrot.slane %v186_v18, 4 }
 0x123   :  { %v180_v21 = vrot.slane %v179_v19, 2  ;;  %v188_v22 = vadd.f32 %v187_v20, %v186_v18 }
 0x125   :  { %v181_v23 = vadd.f32 %v180_v21, %v179_v19  ;;  %v189_v24 = vrot.slane %v188_v22, 2 }
 0x127   :  { %v182_v25 = vrot.slane %v181_v23, 1  ;;  %v190_v26 = vadd.f32 %v189_v24, %v188_v22 }
 0x129   :  { %v183_v27 = vadd.f32 %v182_v25, %v181_v23  ;;  %v191_v28 = vrot.slane %v190_v26, 1 }
 0x12b   :  { %v192_v29 = vadd.f32 %v191_v28, %v190_v26  ;;  %v193_v30 = vmul.f32 0.0625, %v183_v27 }
 0x12d   :  { %v194_v31 = vmul.f32 0.0625, %v192_v29  ;;  %v195_v32 = vmul.f32 %v193_v30, %v193_v30 }
 0x12f   :  { %v196_v33 = vsub.f32 %v194_v31, %v195_v32 }
 0x131   :  { %v197_v34 = vmax.f32 %v196_v33, 0.0 }
 0x133   :  { %v199_v35 = vadd.f32 1e-05, %v197_v34 }
 0x135   :  { %299 = vrsqrt.f32 %v199_v35 }
 0x13f   :  { %v300_v40 = vpop.eup %299 }
 0x140   :  { %v201_v41 = vmul.f32 %v300_v40, %v198_v38 }
 0x142   :  { %v203_v43 = vmul.f32 %v201_v41, %v193_v30  ;;  %v209_v44 = vrot.slane %v201_v41, %v208_v39 }
 0x144   :  { %v204_v45 = vsub.f32 %v202_v42, %v203_v43  ;;  %v211_v46 = vmul.f32 %v209_v44, %v161_v10  ;;  %v212_v47 = vmul.f32 %v209_v44, %v164_v12 }
 0x146   :  { %v217_v48 = vrot.slane %v204_v45, %v208_v39 }
 0x148   :  { %v219_v49 = vadd.f32 %v217_v48, %v211_v46  ;;  %v220_v50 = vadd.f32 %v217_v48, %v212_v47 }
 0x14a   :  { %v221_v51 = vmax.f32 %v219_v49, 0.0  ;;  %v222_v52 = vmax.f32 %v220_v50, 0.0 }
 0x14c   :  { %224 = vst [vmem:[#allocation8 + $0x8] sm:$0xff] %v222_v52  ;;  %223 = vst [vmem:[#allocation8] sm:$0xff] %v221_v51 }
 0x14d   :  { %356 = shalt.err (!%p353_p6)
}
 0x14e   :  { %s357_s20 = scalar_lea.hbm %s453_s4, 256 }
 0x14f   :  { %p358_p7 = scmp.ne.s32.totalorder %s453_s4, %s357_s20  ;;  %p361_p8 = scmp.lt.u32.totalorder %s357_s20, %s453_s4 }
 0x151   :  { %p363_p9 = pnand %p361_p8, %p358_p7 }
 0x153   :  { %366 = shalt.err (!%p363_p9)
}
 0x154   :  { %s380_s25 = smov 128   ;;  %s381_s26 = smov 8  }
 0x155   :  { %236 = dma.vmem_to_hbm [thread:$0]  %s231_s18, 256, %s453_s4, [#allocation5], %s380_s25, %s380_s25, %s381_s26  }
 0x156   :  { %371 = dma.done.wait [#allocation5], 256  }
 0x157   :  { %372 = vsyncadd [#allocation5], 4294967040 }
 0x158   :  { %240 = vsyncpa [#allocation4], 1 }
 0x159   :  { %241 = vsyncpa [#allocation7], 1 }
 0x15a   :  { %242 = vsyncpa [#allocation5], 1 }

// kernel: tpu_custom_call.1
= control target key start
LH: loop header
LB: loop body
LE: loop exit
PB: predicated region body
PF: predicated region fallthrough
CT: control target
= control target key end

     0   :  { %9 = vsyncpa [#allocation4], 0  ;;  %s449_s0 = inlined_call_operand.hbm [shape: bf16[16,128], index: 0, kind: input, shape index: {}]   ;;  %s450_s1 = inlined_call_operand.hbm [shape: bf16[128,128], index: 1, kind: input, shape index: {}]   ;;  %s451_s2 = inlined_call_operand.vmem [shape: f32[1,128], index: 2, kind: input, shape index: {}]   ;;  %s452_s3 = inlined_call_operand.vmem [shape: f32[1,128], index: 3, kind: input, shape index: {}]   ;;  %s453_s4 = inlined_call_operand.hbm [shape: f32[16,128], index: 4, kind: output, shape index: {}]  }
   0x1   :  { %10 = vsyncpa [#allocation7], 0 }
   0x2   :  { %11 = vsyncpa [#allocation5], 0  ;;  %s373_s15 = smov [#allocation3]   ;;  %s301_s19 = scalar_lea.hbm %s449_s0, 128 }
   0x3   :  { %s17_s16 = sshll.u32 %s373_s15, 4  ;;  %p302_p0 = scmp.ne.s32.totalorder %s449_s0, %s301_s19  ;;  %s18_s16 = int_to_ptr.vmem [resolvable:$true] %s17_s16 }
   0x4   :  { %p305_p1 = scmp.lt.u32.totalorder %s301_s19, %s449_s0 }
   0x6   :  { %p307_p2 = pnand %p305_p1, %p302_p0 }
   0x8   :  { %310 = shalt.err (!%p307_p2)
}
   0x9   :  { %s311_s24 = scalar_lea.vmem %s18_s16, 128  ;;  %p316_p4 = scmp.lt.s32.totalorder %s18_s16, %s18_s16 }
   0xa   :  { %p312_p3 = scmp.ne.s32.totalorder %s18_s16, %s311_s24  ;;  %p317_p5 = scmp.lt.s32.totalorder %s311_s24, %s311_s24 }
   0xc   :  { %p318_p6 = por %p317_p5, %p316_p4 }
   0xe   :  { %p319_p7 = pnand %p318_p6, %p312_p3 }
  0x10   :  { %322 = shalt.err (!%p319_p7)
}
  0x11   :  { %s374_s25 = smov 64   ;;  %s375_s26 = smov 4  }
  0x12   :  { %23 = dma.hbm_to_vmem [thread:$0]  %s449_s0, 128, %s18_s16, [#allocation4], %s374_s25, %s374_s25, %s375_s26  }
  0x13   :  { %s376_s29 = smov [#allocation6]   ;;  %s323_s7 = scalar_lea.hbm %s450_s1, 1024 }
  0x14   :  { %s29_s30 = sshll.u32 %s376_s29, 4  ;;  %p324_p8 = scmp.ne.s32.totalorder %s450_s1, %s323_s7  ;;  %s30_s30 = int_to_ptr.vmem [resolvable:$true] %s29_s30 }
  0x15   :  { %p327_p9 = scmp.lt.u32.totalorder %s323_s7, %s450_s1 }
  0x17   :  { %p329_p10 = pnand %p327_p9, %p324_p8 }
  0x19   :  { %332 = shalt.err (!%p329_p10)
}
  0x1a   :  { %s333_s12 = scalar_lea.vmem %s30_s30, 1024  ;;  %p338_p12 = scmp.lt.s32.totalorder %s30_s30, %s30_s30 }
  0x1b   :  { %p334_p11 = scmp.ne.s32.totalorder %s30_s30, %s333_s12  ;;  %p339_p13 = scmp.lt.s32.totalorder %s333_s12, %s333_s12 }
  0x1d   :  { %p340_p0 = por %p339_p13, %p338_p12 }
  0x1f   :  { %p341_p1 = pnand %p340_p0, %p334_p11 }
  0x21   :  { %344 = shalt.err (!%p341_p1)
}
  0x22   :  { %35 = dma.hbm_to_vmem [thread:$0]  %s450_s1, 1024, %s30_s30, [#allocation7], %s374_s25, %s374_s25, %s375_s26  }
  0x23   :  { %367 = dma.done.wait [#allocation4], 128  }
  0x24   :  { %368 = vsyncadd [#allocation4], 4294967168 }
  0x25   :  { %369 = dma.done.wait [#allocation7], 1024  }
  0x26   :  { %370 = vsyncadd [#allocation7], 4294966272  ;;  %v377_v0 = vmov 0.0   ;;  %vm378_vm0 = vmmov 0   ;;  %v290_v1 = vld [vmem:[#allocation6] sm:$0xff]   ;;  %v291_v2 = vld [vmem:[#allocation6 + $0x8] sm:$0xff]   ;;  %v206_v36 = vlaneseq }
  0x27   :  { %261 = vmatprep.subr.bf16.mxu0 %v377_v0  ;;  %277 = vmatprep.mubr.msk.bf16.mxu0 %vm378_vm0, %v377_v0  ;;  %v292_v3 = vld [vmem:[#allocation6 + $0x10] sm:$0xff]   ;;  %v293_v4 = vld [vmem:[#allocation6 + $0x18] sm:$0xff]   ;;  %v294_v5 = vld [vmem:[#allocation6 + $0x20] sm:$0xff]   ;;  %s379_s17 = smov [#allocation8]  }
  0x28   :  { %262 = vmatpush3.bf16.msra.mxu0 %v290_v1  ;;  %v295_v6 = vld [vmem:[#allocation6 + $0x28] sm:$0xff]   ;;  %v296_v7 = vld [vmem:[#allocation6 + $0x30] sm:$0xff]   ;;  %v297_v8 = vld [vmem:[#allocation6 + $0x38] sm:$0xff]   ;;  %v207_v37 = vshrl.u32 %v206_v36, 7  ;;  %s230_s18 = sshll.u32 %s379_s17, 4  ;;  %s231_s18 = int_to_ptr.vmem [resolvable:$true] %s230_s18 }
  0x29   :  { %263 = vmatprep.subr.bf16.mxu0 %v377_v0  ;;  %v298_v9 = vld [vmem:[#allocation3] sm:$0xff]   ;;  %p350_p3 = scmp.lt.s32.totalorder %s231_s18, %s231_s18 }
  0x2a   :  { %v198_v38 = vld [vmem:[%s451_s2] sm:$0x1]  ;;  %v208_v39 = vsub.s32 0, %v207_v37  ;;  %s345_s2 = scalar_lea.vmem %s231_s18, 256 }
  0x2b   :  { %v202_v42 = vld [vmem:[%s452_s3] sm:$0x1]  ;;  %p346_p2 = scmp.ne.s32.totalorder %s231_s18, %s345_s2  ;;  %p351_p4 = scmp.lt.s32.totalorder %s345_s2, %s345_s2 }
  0x2c   :  { %264 = vmatpush3.bf16.msra.mxu0 %v291_v2 }
  0x2d   :  { %265 = vmatprep.subr.bf16.mxu0 %v377_v0  ;;  %p352_p5 = por %p351_p4, %p350_p3 }
  0x2f   :  { %p353_p6 = pnand %p352_p5, %p346_p2 }
  0x30   :  { %266 = vmatpush3.bf16.msra.mxu0 %v292_v3 }
  0x31   :  { %267 = vmatprep.subr.bf16.mxu0 %v377_v0 }
  0x34   :  { %268 = vmatpush3.bf16.msra.mxu0 %v293_v4 }
  0x35   :  { %269 = vmatprep.subr.bf16.mxu0 %v377_v0 }
  0x38   :  { %270 = vmatpush3.bf16.msra.mxu0 %v294_v5 }
  0x39   :  { %271 = vmatprep.subr.bf16.mxu0 %v377_v0 }
  0x3c   :  { %272 = vmatpush3.bf16.msra.mxu0 %v295_v6 }
  0x3d   :  { %273 = vmatprep.subr.bf16.mxu0 %v377_v0 }
  0x40   :  { %274 = vmatpush3.bf16.msra.mxu0 %v296_v7 }
  0x41   :  { %275 = vmatprep.subr.bf16.mxu0 %v377_v0 }
  0x44   :  { %276 = vmatpush3.bf16.msra.mxu0 %v297_v8 }
  0x47   :  { %278 = vmatmul.mubr.bf16.vlgmr.msra.gmra.mrb[0].mxu0 %v298_v9 }
 0x11a   :  { %v161_v10 = vpop.f32.mrb[0].mxu0 }
 0x11b   :  { %v279_v11 = vpop.f32.mrb[1].mxu0  ;;  %v184_v13 = vmul.f32 %v161_v10, %v161_v10 }
 0x11c   :  { %v164_v12 = vpop.f32.mrb[2].mxu0 }
 0x11d   :  { %v177_v14 = vadd.f32 %v164_v12, %v161_v10  ;;  %v185_v15 = vmul.f32 %v164_v12, %v164_v12  ;;  %v280_v16 = vpop.f32.mrb[3].mxu0 }
 0x11f   :  { %v178_v17 = vrot.slane %v177_v14, 4  ;;  %v186_v18 = vadd.f32 %v185_v15, %v184_v13 }
 0x121   :  { %v179_v19 = vadd.f32 %v178_v17, %v177_v14  ;;  %v187_v20 = vrot.slane %v186_v18, 4 }
 0x123   :  { %v180_v21 = vrot.slane %v179_v19, 2  ;;  %v188_v22 = vadd.f32 %v187_v20, %v186_v18 }
 0x125   :  { %v181_v23 = vadd.f32 %v180_v21, %v179_v19  ;;  %v189_v24 = vrot.slane %v188_v22, 2 }
 0x127   :  { %v182_v25 = vrot.slane %v181_v23, 1  ;;  %v190_v26 = vadd.f32 %v189_v24, %v188_v22 }
 0x129   :  { %v183_v27 = vadd.f32 %v182_v25, %v181_v23  ;;  %v191_v28 = vrot.slane %v190_v26, 1 }
 0x12b   :  { %v192_v29 = vadd.f32 %v191_v28, %v190_v26  ;;  %v193_v30 = vmul.f32 0.0625, %v183_v27 }
 0x12d   :  { %v194_v31 = vmul.f32 0.0625, %v192_v29  ;;  %v195_v32 = vmul.f32 %v193_v30, %v193_v30 }
 0x12f   :  { %v196_v33 = vsub.f32 %v194_v31, %v195_v32 }
 0x131   :  { %v197_v34 = vmax.f32 %v196_v33, 0.0 }
 0x133   :  { %v199_v35 = vadd.f32 1e-05, %v197_v34 }
 0x135   :  { %299 = vrsqrt.f32 %v199_v35 }
 0x13f   :  { %v300_v40 = vpop.eup %299 }
 0x140   :  { %v201_v41 = vmul.f32 %v300_v40, %v198_v38 }
 0x142   :  { %v203_v43 = vmul.f32 %v201_v41, %v193_v30  ;;  %v209_v44 = vrot.slane %v201_v41, %v208_v39 }
 0x144   :  { %v204_v45 = vsub.f32 %v202_v42, %v203_v43  ;;  %v211_v46 = vmul.f32 %v209_v44, %v161_v10  ;;  %v212_v47 = vmul.f32 %v209_v44, %v164_v12 }
 0x146   :  { %v217_v48 = vrot.slane %v204_v45, %v208_v39 }
 0x148   :  { %v219_v49 = vadd.f32 %v217_v48, %v211_v46  ;;  %v220_v50 = vadd.f32 %v217_v48, %v212_v47 }
 0x14a   :  { %v221_v51 = vmax.f32 %v219_v49, 0.0  ;;  %v222_v52 = vmax.f32 %v220_v50, 0.0 }
 0x14c   :  { %224 = vst [vmem:[#allocation8 + $0x8] sm:$0xff] %v222_v52  ;;  %223 = vst [vmem:[#allocation8] sm:$0xff] %v221_v51 }
 0x14d   :  { %356 = shalt.err (!%p353_p6)
}
 0x14e   :  { %s357_s20 = scalar_lea.hbm %s453_s4, 256 }
 0x14f   :  { %p358_p7 = scmp.ne.s32.totalorder %s453_s4, %s357_s20  ;;  %p361_p8 = scmp.lt.u32.totalorder %s357_s20, %s453_s4 }
 0x151   :  { %p363_p9 = pnand %p361_p8, %p358_p7 }
 0x153   :  { %366 = shalt.err (!%p363_p9)
}
 0x154   :  { %s380_s25 = smov 128   ;;  %s381_s26 = smov 8  }
 0x155   :  { %236 = dma.vmem_to_hbm [thread:$0]  %s231_s18, 256, %s453_s4, [#allocation5], %s380_s25, %s380_s25, %s381_s26  }
 0x156   :  { %371 = dma.done.wait [#allocation5], 256  }
 0x157   :  { %372 = vsyncadd [#allocation5], 4294967040 }
 0x158   :  { %240 = vsyncpa [#allocation4], 1 }
 0x159   :  { %241 = vsyncpa [#allocation7], 1 }
 0x15a   :  { %242 = vsyncpa [#allocation5], 1 }

</bundles_post_ra>
